<compile_context>
chip_gen: v5e
topology: v5e:2x2
jax: 0.10.0
libtpu: 0.0.40
codegen_flags: <defaults>
</compile_context>

<pallas_src>
import math

import jax
import jax.numpy as jnp
from jax.experimental import pallas as pl
from jax.experimental.pallas import tpu as pltpu


# ---------------------------------------------------------------------------
# Fast path: metadata-only identity (no bytes moved).
# ---------------------------------------------------------------------------
def _identity_alias_kernel(x_ref, o_ref):
    del x_ref
    # The output HBM buffer aliases the input buffer, so the bytes are already
    # in place; touching the output ref keeps the (otherwise empty) kernel and
    # pins ordering of the aliased output.  No DMA, no VMEM traffic.
    pltpu.touch(o_ref)


def _identity_alias(x):
    return pl.pallas_call(
        _identity_alias_kernel,
        out_shape=jax.ShapeDtypeStruct(x.shape, x.dtype),
        in_specs=[pl.BlockSpec(memory_space=pl.ANY)],
        out_specs=pl.BlockSpec(memory_space=pl.ANY),
        input_output_aliases={0: 0},
    )(x)


# jit + donation: the aliased output reuses x's buffer with no defensive copy.
_identity_alias_jit = jax.jit(_identity_alias, donate_argnums=0)


# ---------------------------------------------------------------------------
# Defensive fallback: lane-dense tiled streaming copy (only used if the
# metadata-only kernel fails to lower on some runtime).
# ---------------------------------------------------------------------------
def _copy_kernel(x_ref, o_ref):
    o_ref[...] = x_ref[...]


def _choose_lane(total):
    """Largest lane width (multiple of 128) from a small candidate set that
    divides `total`; caller guarantees total % 128 == 0."""
    for cand in (4096, 2048, 1024, 512, 256, 128):
        if total % cand == 0:
            return cand
    return 128


def _identity_copy(x):
    shape, dtype = x.shape, x.dtype
    total = math.prod(shape) if shape else 1

    if total % 128 != 0:
        # A lane axis below 128 would force masked partial stores on every
        # tile; use a single full-extent 1-D block instead (always legal).
        flat = x.reshape(total)
        out = pl.pallas_call(
            _copy_kernel,
            out_shape=jax.ShapeDtypeStruct((total,), dtype),
        )(flat)
        return out.reshape(shape)

    lane = _choose_lane(total)
    rows = total // lane
    x2d = x.reshape(rows, lane)

    itemsize = jnp.dtype(dtype).itemsize
    # Dtype-aware sublane alignment: f32 -> 8 rows/vreg, bf16 -> 16, int8/fp8 -> 32.
    sublane = {4: 8, 2: 16, 1: 32}.get(itemsize, 8)

    # ~8 MiB per buffered tile; with (in + out) x double-buffer that is 32 MiB
    # of VMEM, under the 48 MiB cap below (safe on v5e/v6e/v7x alike).
    tile_budget_bytes = 8 * 1024 * 1024
    tile_r = max(1, tile_budget_bytes // (lane * itemsize))
    if tile_r >= rows:
        tile_r = rows                                  # full extent: always legal
    else:
        tile_r = max(sublane, (tile_r // sublane) * sublane)

    grid = (pl.cdiv(rows, tile_r),)

    out2d = pl.pallas_call(
        _copy_kernel,
        out_shape=jax.ShapeDtypeStruct((rows, lane), dtype),
        grid=grid,
        in_specs=[pl.BlockSpec((tile_r, lane), lambda i: (i, 0))],
        out_specs=pl.BlockSpec((tile_r, lane), lambda i: (i, 0)),
        compiler_params=pltpu.CompilerParams(
            dimension_semantics=("parallel",),
            vmem_limit_bytes=48 * 1024 * 1024,
        ),
    )(x2d)
    return out2d.reshape(shape)


_identity_copy_jit = jax.jit(_identity_copy)

_USE_FALLBACK = False


def neural_network_forward(x):
    """Pallas implementation of NeuralNetwork.forward (identity)."""
    global _USE_FALLBACK
    if not _USE_FALLBACK:
        try:
            return _identity_alias_jit(x)
        except Exception:
            # Metadata-only kernel failed to lower on this runtime; fall back
            # to the streaming-copy kernel (still a correct identity).
            _USE_FALLBACK = True
    return _identity_copy_jit(x)


# Deterministic "parameters": the module's nn.Sequential is empty, so there
# are no weights.  Hyperparameters are kept for parity with the module spec.
NUM_CLASSES = 10
INPUT_CHANNELS = 3
INPUT_SIZE = 16   # small spatial size for the example input
HIDDEN_SIZE = 128


if __name__ == "__main__":
    key = jax.random.PRNGKey(0)
    batch = 2
    x = jax.random.normal(
        key, (batch, INPUT_CHANNELS, INPUT_SIZE, INPUT_SIZE), dtype=jnp.float32
    )

    # Snapshot reference values on host BEFORE calling: the input is donated
    # and the output aliases its buffer, so the device array x is consumed.
    x_host = jax.device_get(x)

    y = neural_network_forward(x)
    y = jax.block_until_ready(y)

    # Identity forward: output must equal input exactly.
    assert y.shape == x_host.shape and y.dtype == x_host.dtype
    assert bool(jnp.all(y == jnp.asarray(x_host)))

    print("KERNEL_OK")
</pallas_src>

<mosaic_0001>
module attributes {stable_mosaic.version = 11 : i64} {
  func.func @_identity_alias_kernel(%arg0: memref<2x3x16x16xf32, #tpu.memory_space<any>>, %arg1: memref<2x3x16x16xf32, #tpu.memory_space<any>>) attributes {dimension_semantics = [], scalar_prefetch = 0 : i64, scratch_operands = 0 : i64, tpu.core_type = #tpu.core_type<tc>} {
    return
  }
}

module attributes {stable_mosaic.version = 11 : i64} {
  func.func @_copy_kernel(%arg0: i32, %arg1: memref<3x512xf32, #tpu.memory_space<vmem>>, %arg2: memref<3x512xf32, #tpu.memory_space<vmem>>) attributes {dimension_semantics = [#tpu.dimension_semantics<parallel>], iteration_bounds = array<i64: 1>, scalar_prefetch = 0 : i64, scratch_operands = 0 : i64, tpu.core_type = #tpu.core_type<tc>, window_params = [{transform_indices = @transform_0, window_bounds = array<i64: 3, 512>}, {transform_indices = @transform_1, window_bounds = array<i64: 3, 512>}]} {
    %c0 = arith.constant 0 : index
    %c0_0 = arith.constant 0 : index
    %0 = vector.load %arg1[%c0, %c0_0] : memref<3x512xf32, #tpu.memory_space<vmem>>, vector<3x512xf32>
    %c0_1 = arith.constant 0 : index
    %c0_2 = arith.constant 0 : index
    %1 = vector.load %arg2[%c0_1, %c0_2] : memref<3x512xf32, #tpu.memory_space<vmem>>, vector<3x512xf32>
    tpu.vector_store %arg2[%c0_1, %c0_2], %0 {strides = array<i32>} : memref<3x512xf32, #tpu.memory_space<vmem>>, vector<3x512xf32>,
    return
  }
  func.func @transform_0(%arg0: i32) -> (i32, i32) {
    %c0_i32 = arith.constant 0 : i32
    %c0_i32_0 = arith.constant 0 : i32
    return %arg0, %c0_i32 : i32, i32
  }
  func.func @transform_1(%arg0: i32) -> (i32, i32) {
    %c0_i32 = arith.constant 0 : i32
    %c0_i32_0 = arith.constant 0 : i32
    return %arg0, %c0_i32 : i32, i32
  }
}

</mosaic_0001>

<bundles_post_ra>
// kernel: _identity_alias.1
= control target key start
LH: loop header
LB: loop body
LE: loop exit
PB: predicated region body
PF: predicated region fallthrough
CT: control target
= control target key end

     0   :  { %s16_s0 = inlined_call_operand.hbm [shape: f32[2,3,16,16], index: 0, kind: input, shape index: {}, may-alias: {0,1}]   ;;  %s17_s1 = inlined_call_operand.hbm [shape: f32[2,3,16,16], index: 1, kind: output, shape index: {}, may-alias: {0,1}]  }

// kernel: _identity_copy.1
= control target key start
LH: loop header
LB: loop body
LE: loop exit
PB: predicated region body
PF: predicated region fallthrough
CT: control target
= control target key end

     0   :  { %s38_s0 = inlined_call_operand.vmem [shape: f32[3,512], index: 0, kind: input, shape index: {}]   ;;  %s39_s1 = inlined_call_operand.vmem [shape: f32[3,512], index: 1, kind: output, shape index: {}]  }
   0x1   :  { %v8_v0 = vld [vmem:[%s38_s0] sm:$0x77]  ;;  %v9_v1 = vld [vmem:[%s38_s0 + $0x8] sm:$0x77] }
   0x2   :  { %10 = vst [vmem:[%s39_s1] sm:$0x77] %v8_v0 }
   0x3   :  { %11 = vst [vmem:[%s39_s1 + $0x8] sm:$0x77] %v9_v1 }

</bundles_post_ra>
